<compile_context>
chip_gen: v5e
topology: v5e:2x2
jax: 0.10.0
libtpu: 0.0.40
codegen_flags: <defaults>
</compile_context>

<pallas_src>
import jax
import jax.numpy as jnp
from jax.experimental import pallas as pl
from jax.experimental.pallas import tpu as pltpu


# ----------------------------- Pallas kernel ------------------------------ #

def _fused_gcn_layer_kernel(a_ref, hw_ref, b_ref, out_ref, acc_ref):
    """One K-step of a sign-split GCN layer on a (row_tile, k_tile) A tile.

        acc += A_cat[i-tile, k-tile] @ HW_cat[k-tile]        (bf16 MXU, f32 acc)
        on last k:  out = relu(acc + b_fused)                (f32 VPU epilogue)

    A_cat = [A_pos | A_neg], HW_cat = [H @ W_pos ; H @ (-W_neg)], and
    b_fused = b_pos - b_neg are all folded host-side, so the original
    pos-minus-neg subtraction, second bias add and second matmul disappear.
    """
    k = pl.program_id(1)

    @pl.when(k == 0)
    def _():
        acc_ref[...] = jnp.zeros_like(acc_ref)

    acc_ref[...] += jnp.dot(a_ref[...], hw_ref[...],
                            preferred_element_type=jnp.float32)

    @pl.when(k == pl.num_programs(1) - 1)
    def _():
        out_ref[...] = jnp.maximum(acc_ref[...] + b_ref[...], 0.0
                                   ).astype(out_ref.dtype)


def _fused_gcn_layer(a_cat, hw_cat, b_fused, *, out_dtype, row_tile, k_tile):
    """Row- and K-tiled pallas_call wrapper for one fused sign-split layer."""
    n_pad, k_dim = a_cat.shape
    f_pad = hw_cat.shape[1]
    assert n_pad % row_tile == 0 and k_dim % k_tile == 0

    grid = (n_pad // row_tile, k_dim // k_tile)
    out_itemsize = jnp.dtype(out_dtype).itemsize

    flops = 2 * n_pad * k_dim * f_pad
    bytes_accessed = (
        a_cat.size * a_cat.dtype.itemsize
        + grid[0] * hw_cat.size * hw_cat.dtype.itemsize   # HW re-read per row tile
        + b_fused.size * b_fused.dtype.itemsize
        + n_pad * f_pad * out_itemsize)

    # Explicit scoped-VMEM budget: double-buffered inputs/outputs + f32 acc,
    # ~2x headroom, capped well under v7x's 64 MiB physical VMEM.
    per_step = (2 * row_tile * k_tile * a_cat.dtype.itemsize
                + 2 * k_tile * f_pad * hw_cat.dtype.itemsize
                + 2 * f_pad * b_fused.dtype.itemsize
                + 2 * row_tile * f_pad * out_itemsize
                + row_tile * f_pad * 4)
    vmem_limit = int(min(48 * 1024 * 1024, max(2 * per_step, 32 * 1024 * 1024)))

    return pl.pallas_call(
        _fused_gcn_layer_kernel,
        out_shape=jax.ShapeDtypeStruct((n_pad, f_pad), out_dtype),
        grid=grid,
        in_specs=[
            pl.BlockSpec((row_tile, k_tile), lambda i, k: (i, k)),  # A_cat tile
            pl.BlockSpec((k_tile, f_pad), lambda i, k: (k, 0)),     # HW_cat tile
            pl.BlockSpec((1, f_pad), lambda i, k: (0, 0)),          # fused bias
        ],
        out_specs=pl.BlockSpec((row_tile, f_pad), lambda i, k: (i, 0)),
        scratch_shapes=[pltpu.VMEM((row_tile, f_pad), jnp.float32)],
        compiler_params=pltpu.CompilerParams(
            # rows parallel (v7x megacore), contraction axis arbitrary (trailing)
            dimension_semantics=("parallel", "arbitrary"),
            vmem_limit_bytes=vmem_limit),
        cost_estimate=pl.CostEstimate(
            flops=flops, transcendentals=0, bytes_accessed=bytes_accessed),
    )(a_cat, hw_cat, b_fused)


# ------------------------------- JAX glue --------------------------------- #

def _round_up(x, m):
    return ((x + m - 1) // m) * m


def _pad2(a, rows, cols):
    out = jnp.zeros((rows, cols), a.dtype)
    return out.at[: a.shape[0], : a.shape[1]].set(a)


def edge_gcn_forward(x, a_cat, params, *, row_tile=512, k_tile=512):
    """Forward pass of EdgeGCNRegressor.

    a_cat: (N, 2N) dense normalized adjacency, columns [0,N) = positive-edge
    GCN adjacency, columns [N,2N) = |negative|-edge GCN adjacency.
    """
    n, in_c = x.shape
    hid_c = params["w1p"].shape[1]
    out_c = params["w2p"].shape[1]

    lane = 128
    # Tile selection (clamped for tiny graphs; 512 default per perf review).
    row_tile = min(row_tile, _round_up(n, lane))
    n_pad = _round_up(n, row_tile)
    k_dim = 2 * n_pad
    k_tile = min(k_tile, k_dim)
    if k_dim % k_tile:
        k_tile = row_tile            # row_tile | n_pad, hence | 2*n_pad

    in_pad = _round_up(in_c, lane)
    hid_pad = _round_up(hid_c, lane)
    out_pad = _round_up(out_c, lane)

    # Pad the two adjacency halves separately so the negative half starts at
    # column n_pad (matching the stacked HW_cat layout).  bf16 for the MXU.
    a_pad = jnp.zeros((n_pad, k_dim), a_cat.dtype)
    a_pad = a_pad.at[:n, :n].set(a_cat[:, :n])
    a_pad = a_pad.at[:n, n_pad:n_pad + n].set(a_cat[:, n:])
    ab = a_pad.astype(jnp.bfloat16)

    # Sign fold (-W_neg) and bias fold (b_pos - b_neg), once, host-side.
    w1p = _pad2(params["w1p"], in_pad, hid_pad).astype(jnp.bfloat16)
    w1n = _pad2(-params["w1n"], in_pad, hid_pad).astype(jnp.bfloat16)
    b1 = _pad2(params["b1p"] - params["b1n"], 1, hid_pad)            # f32
    w2p = _pad2(params["w2p"], hid_pad, out_pad).astype(jnp.bfloat16)
    w2n = _pad2(-params["w2n"], hid_pad, out_pad).astype(jnp.bfloat16)
    b2 = _pad2(params["b2p"] - params["b2n"], 1, out_pad)            # f32

    xb = _pad2(x, n_pad, in_pad).astype(jnp.bfloat16)

    # Project-first: tiny O(N*C*F) projections precomputed once (plain JAX),
    # stacked so the Pallas kernel does a single O(N^2*F) matmul per layer.
    hw1 = jnp.concatenate(
        [jnp.dot(xb, w1p, preferred_element_type=jnp.float32),
         jnp.dot(xb, w1n, preferred_element_type=jnp.float32)],
        axis=0).astype(jnp.bfloat16)                                  # (2n_pad, hid_pad)

    # layer 1 (intermediate kept in bf16: it feeds the layer-2 MXU anyway)
    h = _fused_gcn_layer(ab, hw1, b1, out_dtype=jnp.bfloat16,
                         row_tile=row_tile, k_tile=k_tile)

    hw2 = jnp.concatenate(
        [jnp.dot(h, w2p, preferred_element_type=jnp.float32),
         jnp.dot(h, w2n, preferred_element_type=jnp.float32)],
        axis=0).astype(jnp.bfloat16)                                  # (2n_pad, out_pad)

    # layer 2 (final output in f32)
    o = _fused_gcn_layer(ab, hw2, b2, out_dtype=jnp.float32,
                         row_tile=row_tile, k_tile=k_tile)
    return o[:n, :out_c]


def gcn_norm_dense_signed(edge_index, edge_weight, num_nodes):
    """Dense sign-split normalized adjacency, built directly as (N, 2N).

    Columns [0,N): PyG gcn_norm of the positive-weight edges (self loops,
    symmetric deg^-1/2); columns [N,2N): same for |negative-weight| edges.
    out_pos = A[:, :N] @ x,  out_neg = A[:, N:] @ x.
    """
    src = edge_index[0]
    tgt = edge_index[1]
    loop = jnp.arange(num_nodes, dtype=src.dtype)
    src_all = jnp.concatenate([src, loop])
    tgt_all = jnp.concatenate([tgt, loop])
    ones = jnp.ones((num_nodes,), edge_weight.dtype)

    def half(w_edges):
        w = jnp.concatenate([w_edges, ones])
        deg = jnp.zeros((num_nodes,), w.dtype).at[tgt_all].add(w)
        dinv = jnp.where(deg > 0, jax.lax.rsqrt(deg), 0.0)
        return dinv[src_all] * w * dinv[tgt_all]

    norm_pos = half(jnp.where(edge_weight >= 0, edge_weight, 0.0))
    norm_neg = half(jnp.where(edge_weight < 0, -edge_weight, 0.0))

    adj = jnp.zeros((num_nodes, 2 * num_nodes), edge_weight.dtype)
    adj = adj.at[tgt_all, src_all].add(norm_pos)
    adj = adj.at[tgt_all, num_nodes + src_all].add(norm_neg)
    return adj


def make_params(key, in_c, hid_c, out_c):
    ks = jax.random.split(key, 8)

    def glorot(k, fan_in, fan_out):
        bound = jnp.sqrt(6.0 / (fan_in + fan_out)).astype(jnp.float32)
        return jax.random.uniform(k, (fan_in, fan_out), jnp.float32,
                                  -bound, bound)

    def bias(k, n):
        return 0.01 * jax.random.normal(k, (1, n), jnp.float32)

    return {
        "w1p": glorot(ks[0], in_c, hid_c), "b1p": bias(ks[1], hid_c),
        "w1n": glorot(ks[2], in_c, hid_c), "b1n": bias(ks[3], hid_c),
        "w2p": glorot(ks[4], hid_c, out_c), "b2p": bias(ks[5], out_c),
        "w2n": glorot(ks[6], hid_c, out_c), "b2n": bias(ks[7], out_c),
    }
    # TODO(synk): edge_mlp (predict()) is not exercised by forward(); omitted.


def ref_forward_f32(x, a_cat, p):
    """Pure-f32 reference with the original module's project-first ordering."""
    n = x.shape[0]
    a_pos, a_neg = a_cat[:, :n], a_cat[:, n:]
    h = jax.nn.relu((a_pos @ (x @ p["w1p"]) + p["b1p"])
                    - (a_neg @ (x @ p["w1n"]) + p["b1n"]))
    o = jax.nn.relu((a_pos @ (h @ p["w2p"]) + p["b2p"])
                    - (a_neg @ (h @ p["w2n"]) + p["b2n"]))
    return o


def ref_forward_mirror(x, a_cat, p):
    """Reference mirroring the kernel numerics: bf16 MXU inputs, f32
    accumulation, project-first with sign/bias folding and fused operand."""
    ab = a_cat.astype(jnp.bfloat16)

    def layer(h_b, wp, wn, bp, bn):
        hw = jnp.concatenate(
            [jnp.dot(h_b, wp.astype(jnp.bfloat16),
                     preferred_element_type=jnp.float32),
             jnp.dot(h_b, (-wn).astype(jnp.bfloat16),
                     preferred_element_type=jnp.float32)],
            axis=0).astype(jnp.bfloat16)
        o = jnp.dot(ab, hw, preferred_element_type=jnp.float32) + (bp - bn)
        return jax.nn.relu(o)

    h = layer(x.astype(jnp.bfloat16), p["w1p"], p["w1n"], p["b1p"], p["b1n"])
    return layer(h.astype(jnp.bfloat16), p["w2p"], p["w2n"], p["b2p"],
                 p["b2n"])


# --------------------------------- main ------------------------------------ #

if __name__ == "__main__":
    N, IN_C, HID_C, OUT_C, E = 8, 4, 16, 8, 20

    key = jax.random.PRNGKey(0)
    k_x, k_s, k_t, k_w, k_p = jax.random.split(key, 5)

    x = jax.random.normal(k_x, (N, IN_C), jnp.float32)
    src = jax.random.randint(k_s, (E,), 0, N)
    tgt = jax.random.randint(k_t, (E,), 0, N)
    edge_index = jnp.stack([src, tgt])                       # (2, E)
    edge_weight = jax.random.normal(k_w, (E,), jnp.float32)  # mixed signs

    # sign split + self loops + symmetric normalization, directly as (N, 2N)
    a_cat = gcn_norm_dense_signed(edge_index, edge_weight, N)

    params = make_params(k_p, IN_C, HID_C, OUT_C)

    out = edge_gcn_forward(x, a_cat, params)
    out = jax.block_until_ready(out)
    assert out.shape == (N, OUT_C)

    # tight check vs. a JAX mirror of the kernel numerics
    ref_m = ref_forward_mirror(x, a_cat, params)
    assert jnp.allclose(out, ref_m, atol=5e-3, rtol=5e-3), (
        f"mirror max abs err {jnp.max(jnp.abs(out - ref_m))}")

    # loose check vs. the pure-f32 module semantics (bf16 rounding only)
    ref_f = ref_forward_f32(x, a_cat, params)
    assert jnp.allclose(out, ref_f, atol=5e-2, rtol=5e-2), (
        f"f32-ref max abs err {jnp.max(jnp.abs(out - ref_f))}")

    print("KERNEL_OK")
</pallas_src>

<mosaic_0001>
module attributes {stable_mosaic.version = 11 : i64} {
  func.func @_fused_gcn_layer_kernel(%arg0: i32, %arg1: i32, %arg2: memref<128x256xbf16, #tpu.memory_space<vmem>>, %arg3: memref<256x128xbf16, #tpu.memory_space<vmem>>, %arg4: memref<1x128xf32, #tpu.memory_space<vmem>>, %arg5: memref<128x128xbf16, #tpu.memory_space<vmem>>, %arg6: memref<128x128xf32, #tpu.memory_space<vmem>>) attributes {dimension_semantics = [#tpu.dimension_semantics<parallel>, #tpu.dimension_semantics<arbitrary>], iteration_bounds = array<i64: 1, 1>, scalar_prefetch = 0 : i64, scratch_operands = 1 : i64, tpu.core_type = #tpu.core_type<tc>, window_params = [{transform_indices = @transform_0, window_bounds = array<i64: 128, 256>}, {transform_indices = @transform_1, window_bounds = array<i64: 256, 128>}, {pipeline_mode = #tpu.pipeline_mode<synchronous>, transform_indices = @transform_2, window_bounds = array<i64: 1, 128>}, {transform_indices = @transform_3, window_bounds = array<i64: 128, 128>}]} {
    %c0_i32 = arith.constant 0 : i32
    %0 = arith.cmpi eq, %arg1, %c0_i32 : i32
    %1 = arith.extui %0 : i1 to i32
    %c0_i32_0 = arith.constant 0 : i32
    %2 = arith.cmpi ne, %1, %c0_i32_0 : i32
    scf.if %2 {
      %cst_10 = arith.constant 0.000000e+00 : f32
      %12 = vector.broadcast %cst_10 : f32 to vector<128x128xf32>
      %c0_11 = arith.constant 0 : index
      %c0_12 = arith.constant 0 : index
      %13 = vector.load %arg6[%c0_11, %c0_12] : memref<128x128xf32, #tpu.memory_space<vmem>>, vector<128x128xf32>
      tpu.vector_store %arg6[%c0_11, %c0_12], %12 {strides = array<i32>} : memref<128x128xf32, #tpu.memory_space<vmem>>, vector<128x128xf32>,
    } else {
    }
    %c0 = arith.constant 0 : index
    %c0_1 = arith.constant 0 : index
    %3 = vector.load %arg6[%c0, %c0_1] : memref<128x128xf32, #tpu.memory_space<vmem>>, vector<128x128xf32>
    %c0_2 = arith.constant 0 : index
    %c0_3 = arith.constant 0 : index
    %4 = vector.load %arg2[%c0_2, %c0_3] : memref<128x256xbf16, #tpu.memory_space<vmem>>, vector<128x256xbf16>
    %c0_4 = arith.constant 0 : index
    %c0_5 = arith.constant 0 : index
    %5 = vector.load %arg3[%c0_4, %c0_5] : memref<256x128xbf16, #tpu.memory_space<vmem>>, vector<256x128xbf16>
    %cst = arith.constant dense<0.000000e+00> : vector<128x128xf32>
    %6 = tpu.matmul %4, %5, %cst {dimension_numbers = #tpu.dot_dimension_numbers<[1], [0], [0], [1], [0, 0, 1, 1], [], []>} : vector<128x256xbf16>, vector<256x128xbf16>, vector<128x128xf32> -> vector<128x128xf32>
    %7 = arith.addf %3, %6 : vector<128x128xf32>
    %c0_6 = arith.constant 0 : index
    %c0_7 = arith.constant 0 : index
    %8 = vector.load %arg6[%c0_6, %c0_7] : memref<128x128xf32, #tpu.memory_space<vmem>>, vector<128x128xf32>
    tpu.vector_store %arg6[%c0_6, %c0_7], %7 {strides = array<i32>} : memref<128x128xf32, #tpu.memory_space<vmem>>, vector<128x128xf32>,
    %c0_i32_8 = arith.constant 0 : i32
    %9 = arith.cmpi eq, %arg1, %c0_i32_8 : i32
    %10 = arith.extui %9 : i1 to i32
    %c0_i32_9 = arith.constant 0 : i32
    %11 = arith.cmpi ne, %10, %c0_i32_9 : i32
    scf.if %11 {
      %c0_10 = arith.constant 0 : index
      %c0_11 = arith.constant 0 : index
      %12 = vector.load %arg6[%c0_10, %c0_11] : memref<128x128xf32, #tpu.memory_space<vmem>>, vector<128x128xf32>
      %c0_12 = arith.constant 0 : index
      %c0_13 = arith.constant 0 : index
      %13 = vector.load %arg4[%c0_12, %c0_13] : memref<1x128xf32, #tpu.memory_space<vmem>>, vector<1x128xf32>
      %14 = vector.broadcast %13 : vector<1x128xf32> to vector<128x128xf32>
      %15 = arith.addf %12, %14 : vector<128x128xf32>
      %cst_14 = arith.constant 0.000000e+00 : f32
      %16 = vector.broadcast %cst_14 : f32 to vector<128x128xf32>
      %17 = arith.maximumf %15, %16 : vector<128x128xf32>
      %18 = arith.truncf %17 : vector<128x128xf32> to vector<128x128xbf16>
      %c0_15 = arith.constant 0 : index
      %c0_16 = arith.constant 0 : index
      %19 = vector.load %arg5[%c0_15, %c0_16] : memref<128x128xbf16, #tpu.memory_space<vmem>>, vector<128x128xbf16>
      tpu.vector_store %arg5[%c0_15, %c0_16], %18 {strides = array<i32>} : memref<128x128xbf16, #tpu.memory_space<vmem>>, vector<128x128xbf16>,
    } else {
    }
    return
  }
  func.func @transform_0(%arg0: i32, %arg1: i32) -> (i32, i32) {
    %c0_i32 = arith.constant 0 : i32
    return %arg0, %arg1 : i32, i32
  }
  func.func @transform_1(%arg0: i32, %arg1: i32) -> (i32, i32) {
    %c0_i32 = arith.constant 0 : i32
    %c0_i32_0 = arith.constant 0 : i32
    return %arg1, %c0_i32 : i32, i32
  }
  func.func @transform_2(%arg0: i32, %arg1: i32) -> (i32, i32) {
    %c0_i32 = arith.constant 0 : i32
    %c0_i32_0 = arith.constant 0 : i32
    %c0_i32_1 = arith.constant 0 : i32
    return %c0_i32, %c0_i32_0 : i32, i32
  }
  func.func @transform_3(%arg0: i32, %arg1: i32) -> (i32, i32) {
    %c0_i32 = arith.constant 0 : i32
    %c0_i32_0 = arith.constant 0 : i32
    return %arg0, %c0_i32 : i32, i32
  }
}

</mosaic_0001>

<bundles_post_ra>
// kernel: tpu_custom_call.1
= control target key start
LH: loop header
LB: loop body
LE: loop exit
PB: predicated region body
PF: predicated region fallthrough
CT: control target
= control target key end

     0   :  { %8 = vsyncpa [#allocation4], 0  ;;  %s916_s0 = inlined_call_operand.hbm [shape: bf16[128,256], index: 0, kind: input, shape index: {}]   ;;  %s917_s1 = inlined_call_operand.hbm [shape: bf16[256,128], index: 1, kind: input, shape index: {}]   ;;  %s918_s2 = inlined_call_operand.vmem [shape: f32[1,128], index: 2, kind: input, shape index: {}]   ;;  %s919_s3 = inlined_call_operand.hbm [shape: bf16[128,128], index: 3, kind: output, shape index: {}]  }
   0x1   :  { %9 = vsyncpa [#allocation7], 0 }
   0x2   :  { %10 = vsyncpa [#allocation5], 0  ;;  %s15_s14 = sshll.u32 %s916_s0, 4  ;;  %s853_s15 = smov [#allocation3]   ;;  %s16_s14 = int_to_ptr.hbm [resolvable:$true] %s15_s14 }
   0x3   :  { %s17_s16 = sshll.u32 %s853_s15, 4  ;;  %s28_s19 = sshll.u32 %s917_s1, 4  ;;  %s18_s16 = int_to_ptr.vmem [resolvable:$true] %s17_s16  ;;  %s29_s19 = int_to_ptr.hbm [resolvable:$true] %s28_s19 }
   0x4   :  { %s854_s20 = smov 128   ;;  %s855_s21 = smov 8  }
   0x5   :  { %23 = dma.hbm_to_vmem [thread:$0]  %s16_s14, 2048, %s18_s16, [#allocation4], %s854_s20, %s854_s20, %s855_s21  }
   0x6   :  { %s856_s22 = smov [#allocation6]   ;;  %s857_s24 = smov 64  }
   0x7   :  { %s30_s23 = sshll.u32 %s856_s22, 4  ;;  %s858_s25 = smov 4   ;;  %s31_s23 = int_to_ptr.vmem [resolvable:$true] %s30_s23 }
   0x8   :  { %36 = dma.hbm_to_vmem [thread:$0]  %s29_s19, 2048, %s31_s23, [#allocation7], %s857_s24, %s857_s24, %s858_s25  }
   0x9   :  { %847 = dma.done.wait [#allocation4], 2048  }
   0xa   :  { %848 = vsyncadd [#allocation4], 4294965248 }
   0xb   :  { %849 = dma.done.wait [#allocation7], 2048  }
   0xc   :  { %850 = vsyncadd [#allocation7], 4294965248  ;;  %v695_v0 = vld [vmem:[#allocation6 + $0x38] sm:$0xff]  ;;  %v694_v2 = vld [vmem:[#allocation6 + $0x30] sm:$0xff]  ;;  %s530_s29 = sshll.u32 %s919_s3, 4  ;;  %s531_s29 = int_to_ptr.hbm [resolvable:$true] %s530_s29 }
   0xd   :  { %v703_v1 = vld [vmem:[#allocation6 + $0x78] sm:$0xff]  ;;  %307 = vmatpush.bf16.msra.mxu0 %v695_v0  ;;  %751 = vmatpush.bf16.msra.mxu2 %v695_v0  ;;  %v702_v3 = vld [vmem:[#allocation6 + $0x70] sm:$0xff]  ;;  %v693_v4 = vld [vmem:[#allocation6 + $0x28] sm:$0xff] }
   0xe   :  { %356 = vmatpush.bf16.msra.mxu1 %v703_v1  ;;  %759 = vmatpush.bf16.msra.mxu3 %v703_v1  ;;  %v701_v5 = vld [vmem:[#allocation6 + $0x68] sm:$0xff]  ;;  %v692_v6 = vld [vmem:[#allocation6 + $0x20] sm:$0xff]  ;;  %v691_v8 = vld [vmem:[#allocation6 + $0x18] sm:$0xff] }
   0xf   :  { %v700_v7 = vld [vmem:[#allocation6 + $0x60] sm:$0xff]  ;;  %v699_v9 = vld [vmem:[#allocation6 + $0x58] sm:$0xff]  ;;  %v690_v10 = vld [vmem:[#allocation6 + $0x10] sm:$0xff] }
  0x10   :  { %v698_v11 = vld [vmem:[#allocation6 + $0x50] sm:$0xff]  ;;  %v689_v12 = vld [vmem:[#allocation6 + $0x8] sm:$0xff]  ;;  %v688_v14 = vld [vmem:[#allocation6] sm:$0xff] }
  0x11   :  { %308 = vmatpush.bf16.msra.mxu0 %v694_v2  ;;  %752 = vmatpush.bf16.msra.mxu2 %v694_v2  ;;  %v697_v13 = vld [vmem:[#allocation6 + $0x48] sm:$0xff]  ;;  %v696_v15 = vld [vmem:[#allocation6 + $0x40] sm:$0xff]  ;;  %v554_v28 = vld [vmem:[#allocation3 + $0x10] sm:$0xf] }
  0x12   :  { %357 = vmatpush.bf16.msra.mxu1 %v702_v3  ;;  %760 = vmatpush.bf16.msra.mxu3 %v702_v3  ;;  %v546_v16 = vld [vmem:[#allocation3] sm:$0xf]  ;;  %v673_v17 = vld [vmem:[#allocation3 + $0x4] sm:$0xf0]  ;;  %v672_v20 = vld [vmem:[#allocation3 + $0x4] sm:$0xf] }
  0x13   :  { %v578_v18 = vld [vmem:[#allocation3 + $0x40] sm:$0xf]  ;;  %v681_v19 = vld [vmem:[#allocation3 + $0x44] sm:$0xf0]  ;;  %v548_v21 = vld [vmem:[#allocation3 + $0x8] sm:$0xf0]  ;;  %v547_v24 = vor.u32 %v673_v17, %v546_v16 }
  0x14   :  { %v680_v22 = vld [vmem:[#allocation3 + $0x44] sm:$0xf]  ;;  %v580_v23 = vld [vmem:[#allocation3 + $0x48] sm:$0xf0]  ;;  %v579_v25 = vor.u32 %v681_v19, %v578_v18  ;;  %v551_v26 = vor.u32 %v672_v20, %v548_v21  ;;  %v675_v29 = vld [vmem:[#allocation3 + $0x14] sm:$0xf0] }
  0x15   :  { %309 = vmatpush.bf16.msra.mxu0 %v693_v4  ;;  %753 = vmatpush.bf16.msra.mxu2 %v693_v4  ;;  %v583_v27 = vor.u32 %v680_v22, %v580_v23  ;;  %v586_v30 = vld [vmem:[#allocation3 + $0x50] sm:$0xf]  ;;  %v683_v31 = vld [vmem:[#allocation3 + $0x54] sm:$0xf0]  ;;  %v674_v32 = vld [vmem:[#allocation3 + $0x14] sm:$0xf]  ;;  %v555_v36 = vor.u32 %v675_v29, %v554_v28 }
  0x16   :  { %358 = vmatpush.bf16.msra.mxu1 %v701_v5  ;;  %761 = vmatpush.bf16.msra.mxu3 %v701_v5  ;;  %v556_v33 = vld [vmem:[#allocation3 + $0x18] sm:$0xf0]  ;;  %v682_v34 = vld [vmem:[#allocation3 + $0x54] sm:$0xf]  ;;  %v587_v37 = vor.u32 %v683_v31, %v586_v30  ;;  %v562_v40 = vld [vmem:[#allocation3 + $0x20] sm:$0xf] }
  0x17   :  { %v588_v35 = vld [vmem:[#allocation3 + $0x58] sm:$0xf0]  ;;  %v559_v38 = vor.u32 %v674_v32, %v556_v33  ;;  %v677_v41 = vld [vmem:[#allocation3 + $0x24] sm:$0xf0]  ;;  %v594_v42 = vld [vmem:[#allocation3 + $0x60] sm:$0xf] }
  0x18   :  { %v591_v39 = vor.u32 %v682_v34, %v588_v35  ;;  %v685_v43 = vld [vmem:[#allocation3 + $0x64] sm:$0xf0]  ;;  %v676_v44 = vld [vmem:[#allocation3 + $0x24] sm:$0xf]  ;;  %v564_v45 = vld [vmem:[#allocation3 + $0x28] sm:$0xf0]  ;;  %v563_v48 = vor.u32 %v677_v41, %v562_v40 }
  0x19   :  { %310 = vmatpush.bf16.msra.mxu0 %v692_v6  ;;  %754 = vmatpush.bf16.msra.mxu2 %v692_v6  ;;  %v684_v46 = vld [vmem:[#allocation3 + $0x64] sm:$0xf]  ;;  %v596_v47 = vld [vmem:[#allocation3 + $0x68] sm:$0xf0]  ;;  %v595_v49 = vor.u32 %v685_v43, %v594_v42  ;;  %v567_v50 = vor.u32 %v676_v44, %v564_v45  ;;  %v570_v52 = vld [vmem:[#allocation3 + $0x30] sm:$0xf] }
  0x1a   :  { %359 = vmatpush.bf16.msra.mxu1 %v700_v7  ;;  %762 = vmatpush.bf16.msra.mxu3 %v700_v7  ;;  %v599_v51 = vor.u32 %v684_v46, %v596_v47  ;;  %v679_v53 = vld [vmem:[#allocation3 + $0x34] sm:$0xf0]  ;;  %v602_v54 = vld [vmem:[#allocation3 + $0x70] sm:$0xf]  ;;  %v678_v56 = vld [vmem:[#allocation3 + $0x34] sm:$0xf] }
  0x1b   :  { %v687_v55 = vld [vmem:[#allocation3 + $0x74] sm:$0xf0]  ;;  %v572_v57 = vld [vmem:[#allocation3 + $0x38] sm:$0xf0]  ;;  %v686_v58 = vld [vmem:[#allocation3 + $0x74] sm:$0xf]  ;;  %v571_v60 = vor.u32 %v679_v53, %v570_v52 }
  0x1c   :  { %v604_v59 = vld [vmem:[#allocation3 + $0x78] sm:$0xf0]  ;;  %v603_v61 = vor.u32 %v687_v55, %v602_v54  ;;  %v575_v62 = vor.u32 %v678_v56, %v572_v57  ;;  %v892_v3 = vld [vmem:[%s918_s2] ss:$0 sm:$0xff]  ;;  %s859_s2 = smov [#allocation8]  }
  0x1d   :  { %311 = vmatpush.bf16.msra.mxu0 %v691_v8  ;;  %755 = vmatpush.bf16.msra.mxu2 %v691_v8  ;;  %v607_v63 = vor.u32 %v686_v58, %v604_v59  ;;  %s528_s26 = sshll.u32 %s859_s2, 4  ;;  %s529_s26 = int_to_ptr.vmem [resolvable:$true] %s528_s26 }
  0x1e   :  { %360 = vmatpush.bf16.msra.mxu1 %v699_v9  ;;  %763 = vmatpush.bf16.msra.mxu3 %v699_v9 }
  0x21   :  { %312 = vmatpush.bf16.msra.mxu0 %v690_v10  ;;  %756 = vmatpush.bf16.msra.mxu2 %v690_v10 }
  0x22   :  { %361 = vmatpush.bf16.msra.mxu1 %v698_v11  ;;  %764 = vmatpush.bf16.msra.mxu3 %v698_v11 }
  0x25   :  { %313 = vmatpush.bf16.msra.mxu0 %v689_v12  ;;  %757 = vmatpush.bf16.msra.mxu2 %v689_v12 }
  0x26   :  { %362 = vmatpush.bf16.msra.mxu1 %v697_v13  ;;  %765 = vmatpush.bf16.msra.mxu3 %v697_v13 }
  0x29   :  { %314 = vmatpush.bf16.msra.mxu0 %v688_v14  ;;  %758 = vmatpush.bf16.msra.mxu2 %v688_v14 }
  0x2a   :  { %363 = vmatpush.bf16.msra.mxu1 %v696_v15  ;;  %766 = vmatpush.bf16.msra.mxu3 %v696_v15 }
  0x2c   :  { %315 = vmatmul.bf16.vlgmr.msra.gmra.mxu0 %v547_v24  ;;  %335 = vmatmul.bf16.vlgmr.msra.gmra.mxu2 %v579_v25 }
  0x2d   :  { %364 = vmatmul.bf16.vlgmr.msra.gmra.mxu1 %v551_v26  ;;  %384 = vmatmul.bf16.vlgmr.msra.gmra.mxu3 %v583_v27 }
  0x3c   :  { %320 = vmatmul.bf16.gmra.mxu0 %v555_v36  ;;  %340 = vmatmul.bf16.gmra.mxu2 %v587_v37 }
  0x3d   :  { %369 = vmatmul.bf16.gmra.mxu1 %v559_v38  ;;  %389 = vmatmul.bf16.gmra.mxu3 %v591_v39 }
  0x4c   :  { %325 = vmatmul.bf16.gmra.mxu0 %v563_v48  ;;  %345 = vmatmul.bf16.gmra.mxu2 %v595_v49 }
  0x4d   :  { %374 = vmatmul.bf16.gmra.mxu1 %v567_v50  ;;  %394 = vmatmul.bf16.gmra.mxu3 %v599_v51 }
  0x5c   :  { %330 = vmatmul.bf16.gmra.mxu0 %v571_v60  ;;  %350 = vmatmul.bf16.gmra.mxu2 %v603_v61 }
  0x5d   :  { %379 = vmatmul.bf16.gmra.mxu1 %v575_v62  ;;  %399 = vmatmul.bf16.gmra.mxu3 %v607_v63 }
  0xa9   :  { %v316_v0 = vpop.f32.mrf.mxu0 }
  0xaa   :  { %v365_v1 = vpop.f32.mrf.mxu1 }
  0xab   :  { %v366_v2 = vadd.f32 %v365_v1, %v316_v0 }
  0xad   :  { %v460_v8 = vadd.f32 %v892_v3, %v366_v2 }
  0xaf   :  { %v336_v4 = vpop.f32.mrf.mxu2  ;;  %v476_v12 = vmax.f32 %v460_v8, 0.0 }
  0xb0   :  { %v385_v5 = vpop.f32.mrf.mxu3 }
  0xb1   :  { %v318_v6 = vpop.f32.mrf.mxu0  ;;  %v386_v10 = vadd.f32 %v385_v5, %v336_v4 }
  0xb2   :  { %v367_v7 = vpop.f32.mrf.mxu1 }
  0xb3   :  { %v368_v9 = vadd.f32 %v367_v7, %v318_v6  ;;  %v468_v16 = vadd.f32 %v892_v3, %v386_v10 }
  0xb5   :  { %v461_v11 = vadd.f32 %v892_v3, %v368_v9  ;;  %v484_v22 = vmax.f32 %v468_v16, 0.0 }
  0xb7   :  { %v477_v13 = vmax.f32 %v461_v11, 0.0  ;;  %v338_v14 = vpop.f32.mrf.mxu2 }
  0xb8   :  { %v387_v15 = vpop.f32.mrf.mxu3 }
  0xb9   :  { %v707_v17 = vpack.c.bf16 %v477_v13, %v476_v12  ;;  %v388_v18 = vadd.f32 %v387_v15, %v338_v14  ;;  %v321_v19 = vpop.f32.mrf.mxu0 }
  0xba   :  { %v370_v20 = vpop.f32.mrf.mxu1 }
  0xbb   :  { %708 = vst [vmem:[#allocation8] sm:$0xff] %v707_v17   ;;  %v469_v21 = vadd.f32 %v892_v3, %v388_v18  ;;  %v371_v25 = vadd.f32 %v370_v20, %v321_v19 }
  0xbd   :  { %v485_v23 = vmax.f32 %v469_v21, 0.0  ;;  %v462_v30 = vadd.f32 %v892_v3, %v371_v25 }
  0xbf   :  { %v727_v24 = vpack.c.bf16 %v485_v23, %v484_v22  ;;  %v341_v26 = vpop.f32.mrf.mxu2  ;;  %v478_v34 = vmax.f32 %v462_v30, 0.0 }
  0xc0   :  { %v390_v27 = vpop.f32.mrf.mxu3 }
  0xc1   :  { %747 = vst [vmem:[#allocation8 + $0x20] sm:$0xff] %v727_v24   ;;  %v323_v28 = vpop.f32.mrf.mxu0  ;;  %v391_v32 = vadd.f32 %v390_v27, %v341_v26 }
  0xc2   :  { %v372_v29 = vpop.f32.mrf.mxu1 }
  0xc3   :  { %v373_v31 = vadd.f32 %v372_v29, %v323_v28  ;;  %v470_v38 = vadd.f32 %v892_v3, %v391_v32 }
  0xc5   :  { %v463_v33 = vadd.f32 %v892_v3, %v373_v31  ;;  %v486_v44 = vmax.f32 %v470_v38, 0.0 }
  0xc7   :  { %v479_v35 = vmax.f32 %v463_v33, 0.0  ;;  %v343_v36 = vpop.f32.mrf.mxu2 }
  0xc8   :  { %v392_v37 = vpop.f32.mrf.mxu3 }
  0xc9   :  { %v712_v39 = vpack.c.bf16 %v479_v35, %v478_v34  ;;  %v393_v40 = vadd.f32 %v392_v37, %v343_v36  ;;  %v326_v41 = vpop.f32.mrf.mxu0 }
  0xca   :  { %v375_v42 = vpop.f32.mrf.mxu1 }
  0xcb   :  { %744 = vst [vmem:[#allocation8 + $0x8] sm:$0xff] %v712_v39   ;;  %v471_v43 = vadd.f32 %v892_v3, %v393_v40  ;;  %v376_v47 = vadd.f32 %v375_v42, %v326_v41 }
  0xcd   :  { %v487_v45 = vmax.f32 %v471_v43, 0.0  ;;  %v464_v52 = vadd.f32 %v892_v3, %v376_v47 }
  0xcf   :  { %v732_v46 = vpack.c.bf16 %v487_v45, %v486_v44  ;;  %v346_v48 = vpop.f32.mrf.mxu2  ;;  %v480_v56 = vmax.f32 %v464_v52, 0.0 }
  0xd0   :  { %v395_v49 = vpop.f32.mrf.mxu3 }
  0xd1   :  { %748 = vst [vmem:[#allocation8 + $0x28] sm:$0xff] %v732_v46   ;;  %v328_v50 = vpop.f32.mrf.mxu0  ;;  %v396_v54 = vadd.f32 %v395_v49, %v346_v48 }
  0xd2   :  { %v377_v51 = vpop.f32.mrf.mxu1 }
  0xd3   :  { %v378_v53 = vadd.f32 %v377_v51, %v328_v50  ;;  %v472_v60 = vadd.f32 %v892_v3, %v396_v54 }
  0xd5   :  { %v465_v55 = vadd.f32 %v892_v3, %v378_v53  ;;  %v488_v2 = vmax.f32 %v472_v60, 0.0 }
  0xd7   :  { %v481_v57 = vmax.f32 %v465_v55, 0.0  ;;  %v348_v58 = vpop.f32.mrf.mxu2 }
  0xd8   :  { %v397_v59 = vpop.f32.mrf.mxu3 }
  0xd9   :  { %v717_v61 = vpack.c.bf16 %v481_v57, %v480_v56  ;;  %v398_v62 = vadd.f32 %v397_v59, %v348_v58  ;;  %v331_v63 = vpop.f32.mrf.mxu0 }
  0xda   :  { %v380_v0 = vpop.f32.mrf.mxu1 }
  0xdb   :  { %745 = vst [vmem:[#allocation8 + $0x10] sm:$0xff] %v717_v61   ;;  %v473_v1 = vadd.f32 %v892_v3, %v398_v62  ;;  %v381_v6 = vadd.f32 %v380_v0, %v331_v63 }
  0xdd   :  { %v489_v4 = vmax.f32 %v473_v1, 0.0  ;;  %v466_v11 = vadd.f32 %v892_v3, %v381_v6 }
  0xdf   :  { %v737_v5 = vpack.c.bf16 %v489_v4, %v488_v2  ;;  %v351_v7 = vpop.f32.mrf.mxu2  ;;  %v482_v15 = vmax.f32 %v466_v11, 0.0 }
  0xe0   :  { %v400_v8 = vpop.f32.mrf.mxu3 }
  0xe1   :  { %749 = vst [vmem:[#allocation8 + $0x30] sm:$0xff] %v737_v5   ;;  %v333_v9 = vpop.f32.mrf.mxu0  ;;  %v401_v13 = vadd.f32 %v400_v8, %v351_v7 }
  0xe2   :  { %v382_v10 = vpop.f32.mrf.mxu1 }
  0xe3   :  { %v383_v12 = vadd.f32 %v382_v10, %v333_v9  ;;  %v474_v19 = vadd.f32 %v892_v3, %v401_v13 }
  0xe5   :  { %v467_v14 = vadd.f32 %v892_v3, %v383_v12  ;;  %v490_v23 = vmax.f32 %v474_v19, 0.0 }
  0xe7   :  { %v483_v16 = vmax.f32 %v467_v14, 0.0  ;;  %v353_v17 = vpop.f32.mrf.mxu2 }
  0xe8   :  { %v402_v18 = vpop.f32.mrf.mxu3 }
  0xe9   :  { %v722_v20 = vpack.c.bf16 %v483_v16, %v482_v15  ;;  %v403_v21 = vadd.f32 %v402_v18, %v353_v17 }
  0xeb   :  { %746 = vst [vmem:[#allocation8 + $0x18] sm:$0xff] %v722_v20   ;;  %v475_v22 = vadd.f32 %v892_v3, %v403_v21 }
  0xed   :  { %v491_v24 = vmax.f32 %v475_v22, 0.0 }
  0xef   :  { %v742_v25 = vpack.c.bf16 %v491_v24, %v490_v23 }
  0xf1   :  { %750 = vst [vmem:[#allocation8 + $0x38] sm:$0xff] %v742_v25  }
  0xf2   :  { %536 = dma.vmem_to_hbm [thread:$0]  %s529_s26, 1024, %s531_s29, [#allocation5], %s857_s24, %s857_s24, %s858_s25  }
  0xf3   :  { %851 = dma.done.wait [#allocation5], 1024  }
  0xf4   :  { %852 = vsyncadd [#allocation5], 4294966272 }
  0xf5   :  { %541 = vsyncpa [#allocation4], 1 }
  0xf6   :  { %542 = vsyncpa [#allocation7], 1 }
  0xf7   :  { %543 = vsyncpa [#allocation5], 1 }

</bundles_post_ra>
